<compile_context>
chip_gen: v7x
topology: tpu7x:2x2x1
jax: 0.10.0
libtpu: 0.0.40
codegen_flags: <defaults>
</compile_context>

<pallas_src>
import jax
import jax.numpy as jnp
from jax import lax
from jax.experimental import pallas as pl
from jax.experimental.pallas import tpu as pltpu


# Large finite negative instead of -inf: identical softmax result for causal
# masking (exp underflows to 0) and robust if padding/segment masks are added.
_MASK_VALUE = -1e30


def pack_qkv_weights(w_key, w_query, w_value, *, mxu_dtype=jnp.bfloat16):
    """Pack [k | v | q] into one (C, 3*Hp) matrix, each in a 128-lane-aligned slot.

    Called ONCE at weight-load time (hoisted out of the per-forward path).
    Columns >= head_size in each slot are zero, so padded lanes contribute
    nothing to any contraction.  Stored in `mxu_dtype` (bf16 by default) so the
    grid-invariant weight DMA moves half the bytes and feeds the MXU directly.
    """
    C, H = w_key.shape
    Hp = pl.cdiv(H, 128) * 128
    w = jnp.zeros((C, 3 * Hp), dtype=mxu_dtype)
    w = w.at[:, 0 * Hp:0 * Hp + H].set(w_key.astype(mxu_dtype))     # k
    w = w.at[:, 1 * Hp:1 * Hp + H].set(w_value.astype(mxu_dtype))   # v
    w = w.at[:, 2 * Hp:2 * Hp + H].set(w_query.astype(mxu_dtype))   # q
    return w


def head_forward(x, w_fused, head_size, *, tile=None):
    """x: (B, T, C); w_fused: pack_qkv_weights(...) output. Returns (B, T, head_size)."""
    B, T, C = x.shape
    H = head_size
    Hp = w_fused.shape[1] // 3
    assert w_fused.shape[0] == C and H <= Hp
    mxu_dtype = w_fused.dtype
    scale = C ** (-0.5)                 # NOTE: module scales by C (embedding), not head_size.

    if tile is None:
        tile = 128 if T % 128 == 0 else T
    assert T % tile == 0, (T, tile)
    n_t = T // tile

    def kernel(x_q_ref, x_kv_ref, w_ref, o_ref, q_scr, m_scr, l_scr, acc_scr):
        # x_q_ref/x_kv_ref: (tile, C)   w_ref: (C, 3*Hp)   o_ref: (tile, H)
        qi = pl.program_id(1)
        ki = pl.program_id(2)

        @pl.when(ki == 0)
        def _init():
            m_scr[...] = jnp.full_like(m_scr, _MASK_VALUE)
            l_scr[...] = jnp.zeros_like(l_scr)
            acc_scr[...] = jnp.zeros_like(acc_scr)
            # q projection once per (batch row, query tile); reused across KV steps.
            q_scr[...] = jnp.dot(
                x_q_ref[...].astype(mxu_dtype), w_ref[:, 2 * Hp:],
                preferred_element_type=jnp.float32).astype(mxu_dtype)

        # Causal tile skip: with square tiles, tile (qi, ki) is fully masked iff ki > qi.
        @pl.when(ki <= qi)
        def _compute():
            # K/V projection for this KV tile: one contiguous (C, 2*Hp) weight slice.
            kv = jnp.dot(x_kv_ref[...].astype(mxu_dtype), w_ref[:, :2 * Hp],
                         preferred_element_type=jnp.float32)        # (tile, 2*Hp) f32
            k = kv[:, :Hp].astype(mxu_dtype)
            v = kv[:, Hp:].astype(mxu_dtype)

            # Scores: contract the head dim of BOTH operands (no explicit k transpose).
            # Zero-padded head lanes contribute nothing.
            s = lax.dot_general(q_scr[...], k, (((1,), (1,)), ((), ())),
                                preferred_element_type=jnp.float32) * scale  # (tile, tile)

            # Per-tile causal mask from grid offsets (only (tile, tile) iotas).
            row = qi * tile + lax.broadcasted_iota(jnp.int32, s.shape, 0)
            col = ki * tile + lax.broadcasted_iota(jnp.int32, s.shape, 1)
            s = jnp.where(col <= row, s, _MASK_VALUE)

            # Online (flash) softmax update; all elementwise math stays f32.
            m_prev = m_scr[...]
            m_new = jnp.maximum(m_prev, jnp.max(s, axis=-1, keepdims=True))
            alpha = jnp.exp(m_prev - m_new)
            p = jnp.exp(s - m_new)
            l_scr[...] = alpha * l_scr[...] + jnp.sum(p, axis=-1, keepdims=True)
            acc_scr[...] = alpha * acc_scr[...] + jnp.dot(
                p.astype(mxu_dtype), v, preferred_element_type=jnp.float32)
            m_scr[...] = m_new

        @pl.when(ki == pl.num_programs(2) - 1)
        def _finalize():
            # Deferred normalization; reciprocal on the EUP (approx vrcp, ~free).
            # Dropout: identity at inference.
            inv_l = pl.reciprocal(l_scr[...], approx=True)
            out = acc_scr[...] * inv_l                               # (tile, Hp)
            o_ref[...] = out[:, :H].astype(o_ref.dtype)

    return pl.pallas_call(
        kernel,
        out_shape=jax.ShapeDtypeStruct((B, T, H), x.dtype),
        grid=(B, n_t, n_t),
        in_specs=[
            # x block for the query tile (constant across the KV axis -> fetched once).
            pl.BlockSpec((None, tile, C), lambda b, qi, ki: (b, qi, 0)),
            # x block for the KV tile; skipped tiles (ki > qi) remap to the previous
            # valid block so no new DMA is issued for them.
            pl.BlockSpec((None, tile, C),
                         lambda b, qi, ki: (b, jnp.minimum(ki, qi), 0)),
            # Packed weights: grid-invariant, DMA'd once.
            pl.BlockSpec((C, 3 * Hp), lambda b, qi, ki: (0, 0)),
        ],
        out_specs=pl.BlockSpec((None, tile, H), lambda b, qi, ki: (b, qi, 0)),
        scratch_shapes=[
            pltpu.VMEM((tile, Hp), mxu_dtype),    # q tile (MXU operand dtype)
            pltpu.VMEM((tile, 1), jnp.float32),   # running max m
            pltpu.VMEM((tile, 1), jnp.float32),   # running denom l
            pltpu.VMEM((tile, Hp), jnp.float32),  # un-normalized accumulator
        ],
        compiler_params=pltpu.CompilerParams(
            dimension_semantics=("parallel", "parallel", "arbitrary")),
    )(x, x, w_fused)


def _reference(x, w_key, w_query, w_value):
    """Pure-JAX reference mirroring the PyTorch forward (eval mode)."""
    B, T, C = x.shape
    k = x @ w_key
    q = x @ w_query
    v = x @ w_value
    scores = (q @ jnp.swapaxes(k, -2, -1)) * (C ** -0.5)
    tril = jnp.tril(jnp.ones((T, T), dtype=bool))
    scores = jnp.where(tril[None, :, :], scores, -jnp.inf)
    weights = jax.nn.softmax(scores, axis=-1)
    return weights @ v


if __name__ == "__main__":
    # Module hyperparameters (small, consistent with the forward pass).
    n_embedding = 32      # C
    head_size = 16        # H
    block_size = 8        # T for the primary test
    dropout_rate = 0.1    # unused at inference

    C, H = n_embedding, head_size
    key = jax.random.PRNGKey(0)
    kx, kk, kq, kv, kx2 = jax.random.split(key, 5)

    # nn.Linear(C, H, bias=False).weight has shape (H, C); we store the transpose.
    w_key = jax.random.normal(kk, (C, H), dtype=jnp.float32) * (C ** -0.5)
    w_query = jax.random.normal(kq, (C, H), dtype=jnp.float32) * (C ** -0.5)
    w_value = jax.random.normal(kv, (C, H), dtype=jnp.float32) * (C ** -0.5)

    # Weight packing hoisted out of the forward path (done once per dtype).
    w_bf16 = pack_qkv_weights(w_key, w_query, w_value)                       # default bf16 MXU path
    w_f32 = pack_qkv_weights(w_key, w_query, w_value, mxu_dtype=jnp.float32)  # exactness check path

    # --- Test 1: module shapes (B=2, T=block_size=8, C=32, H=16), single-tile grid ---
    B, T = 2, block_size
    x = jax.random.normal(kx, (B, T, C), dtype=jnp.float32)
    ref = _reference(x, w_key, w_query, w_value)

    out_f32 = jax.block_until_ready(head_forward(x, w_f32, H))
    assert out_f32.shape == (B, T, H), out_f32.shape
    # pl.reciprocal(approx=True) adds ~1e-4 relative error; tolerance sized accordingly.
    assert jnp.allclose(out_f32, ref, atol=2e-3, rtol=2e-3), "f32-path mismatch (T=8)"

    out_bf16 = jax.block_until_ready(head_forward(x, w_bf16, H))
    assert jnp.allclose(out_bf16, ref, atol=1e-1, rtol=1e-1), "bf16-path mismatch (T=8)"

    # --- Test 2: longer sequence exercising the KV-tiled flash grid (tile=128,
    #     grid (2,2,2), causal skip at (qi=0, ki=1), online softmax across 2 KV tiles) ---
    B2, T2 = 2, 256
    x2 = jax.random.normal(kx2, (B2, T2, C), dtype=jnp.float32)
    ref2 = _reference(x2, w_key, w_query, w_value)

    out2_f32 = jax.block_until_ready(head_forward(x2, w_f32, H))
    assert out2_f32.shape == (B2, T2, H), out2_f32.shape
    assert jnp.allclose(out2_f32, ref2, atol=2e-3, rtol=2e-3), "f32-path mismatch (T=256)"

    out2_bf16 = jax.block_until_ready(head_forward(x2, w_bf16, H))
    assert jnp.allclose(out2_bf16, ref2, atol=1e-1, rtol=1e-1), "bf16-path mismatch (T=256)"

    print("KERNEL_OK")
</pallas_src>

<mosaic_0001>
module attributes {stable_mosaic.version = 11 : i64} {
  func.func @kernel(%arg0: i32, %arg1: i32, %arg2: i32, %arg3: memref<1x8x32xf32, #tpu.memory_space<vmem>>, %arg4: memref<1x8x32xf32, #tpu.memory_space<vmem>>, %arg5: memref<32x384xf32, #tpu.memory_space<vmem>>, %arg6: memref<1x8x16xf32, #tpu.memory_space<vmem>>, %arg7: memref<8x128xf32, #tpu.memory_space<vmem>>, %arg8: memref<8x1xf32, #tpu.memory_space<vmem>>, %arg9: memref<8x1xf32, #tpu.memory_space<vmem>>, %arg10: memref<8x128xf32, #tpu.memory_space<vmem>>) attributes {dimension_semantics = [#tpu.dimension_semantics<parallel>, #tpu.dimension_semantics<parallel>, #tpu.dimension_semantics<arbitrary>], iteration_bounds = array<i64: 2, 1, 1>, scalar_prefetch = 0 : i64, scratch_operands = 4 : i64, tpu.core_type = #tpu.core_type<tc>, window_params = [{transform_indices = @transform_0, window_bounds = array<i64: 1, 8, 32>}, {transform_indices = @transform_1, window_bounds = array<i64: 1, 8, 32>}, {pipeline_mode = #tpu.pipeline_mode<synchronous>, transform_indices = @transform_2, window_bounds = array<i64: 32, 384>}, {transform_indices = @transform_3, window_bounds = array<i64: 1, 8, 16>}]} {
    %c0_i32 = arith.constant 0 : i32
    %0 = arith.cmpi eq, %arg2, %c0_i32 : i32
    %1 = arith.extui %0 : i1 to i32
    %c0_i32_0 = arith.constant 0 : i32
    %2 = arith.cmpi ne, %1, %c0_i32_0 : i32
    scf.if %2 {
      %cst = arith.constant -1.000000e+30 : f32
      %9 = vector.broadcast %cst : f32 to vector<8x1xf32>
      %c0 = arith.constant 0 : index
      %c0_4 = arith.constant 0 : index
      %10 = vector.load %arg8[%c0, %c0_4] : memref<8x1xf32, #tpu.memory_space<vmem>>, vector<8x1xf32>
      tpu.vector_store %arg8[%c0, %c0_4], %9 {strides = array<i32>} : memref<8x1xf32, #tpu.memory_space<vmem>>, vector<8x1xf32>,
      %cst_5 = arith.constant 0.000000e+00 : f32
      %11 = vector.broadcast %cst_5 : f32 to vector<8x1xf32>
      %c0_6 = arith.constant 0 : index
      %c0_7 = arith.constant 0 : index
      %12 = vector.load %arg9[%c0_6, %c0_7] : memref<8x1xf32, #tpu.memory_space<vmem>>, vector<8x1xf32>
      tpu.vector_store %arg9[%c0_6, %c0_7], %11 {strides = array<i32>} : memref<8x1xf32, #tpu.memory_space<vmem>>, vector<8x1xf32>,
      %cst_8 = arith.constant 0.000000e+00 : f32
      %13 = vector.broadcast %cst_8 : f32 to vector<8x128xf32>
      %c0_9 = arith.constant 0 : index
      %c0_10 = arith.constant 0 : index
      %14 = vector.load %arg10[%c0_9, %c0_10] : memref<8x128xf32, #tpu.memory_space<vmem>>, vector<8x128xf32>
      tpu.vector_store %arg10[%c0_9, %c0_10], %13 {strides = array<i32>} : memref<8x128xf32, #tpu.memory_space<vmem>>, vector<8x128xf32>,
      %c0_11 = arith.constant 0 : index
      %c0_12 = arith.constant 0 : index
      %c0_13 = arith.constant 0 : index
      %15 = vector.load %arg3[%c0_11, %c0_12, %c0_13] : memref<1x8x32xf32, #tpu.memory_space<vmem>>, vector<1x8x32xf32>
      %16 = vector.shape_cast %15 : vector<1x8x32xf32> to vector<8x32xf32>
      %c0_14 = arith.constant 0 : index
      %c256 = arith.constant 256 : index
      %17 = vector.load %arg5[%c0_14, %c256] : memref<32x384xf32, #tpu.memory_space<vmem>>, vector<32x128xf32>
      %cst_15 = arith.constant dense<0.000000e+00> : vector<8x128xf32>
      %18 = tpu.matmul %16, %17, %cst_15 {dimension_numbers = #tpu.dot_dimension_numbers<[1], [0], [0], [1], [0, 0, 1, 1], [], []>} : vector<8x32xf32>, vector<32x128xf32>, vector<8x128xf32> -> vector<8x128xf32>
      %c0_16 = arith.constant 0 : index
      %c0_17 = arith.constant 0 : index
      %19 = vector.load %arg7[%c0_16, %c0_17] : memref<8x128xf32, #tpu.memory_space<vmem>>, vector<8x128xf32>
      tpu.vector_store %arg7[%c0_16, %c0_17], %18 {strides = array<i32>} : memref<8x128xf32, #tpu.memory_space<vmem>>, vector<8x128xf32>,
    } else {
    }
    %3 = arith.cmpi sle, %arg2, %arg1 : i32
    %4 = arith.extui %3 : i1 to i32
    %c0_i32_1 = arith.constant 0 : i32
    %5 = arith.cmpi ne, %4, %c0_i32_1 : i32
    scf.if %5 {
      %c0 = arith.constant 0 : index
      %c0_4 = arith.constant 0 : index
      %c0_5 = arith.constant 0 : index
      %9 = vector.load %arg4[%c0, %c0_4, %c0_5] : memref<1x8x32xf32, #tpu.memory_space<vmem>>, vector<1x8x32xf32>
      %10 = vector.shape_cast %9 : vector<1x8x32xf32> to vector<8x32xf32>
      %c0_6 = arith.constant 0 : index
      %c0_7 = arith.constant 0 : index
      %11 = vector.load %arg5[%c0_6, %c0_7] : memref<32x384xf32, #tpu.memory_space<vmem>>, vector<32x256xf32>
      %cst = arith.constant dense<0.000000e+00> : vector<8x256xf32>
      %12 = tpu.matmul %10, %11, %cst {dimension_numbers = #tpu.dot_dimension_numbers<[1], [0], [0], [1], [0, 0, 1, 1], [], []>} : vector<8x32xf32>, vector<32x256xf32>, vector<8x256xf32> -> vector<8x256xf32>
      %13 = vector.extract_strided_slice %12 {offsets = [0, 0], sizes = [8, 128], strides = [1, 1]} : vector<8x256xf32> to vector<8x128xf32>
      %14 = vector.extract_strided_slice %12 {offsets = [0, 128], sizes = [8, 128], strides = [1, 1]} : vector<8x256xf32> to vector<8x128xf32>
      %c0_8 = arith.constant 0 : index
      %c0_9 = arith.constant 0 : index
      %15 = vector.load %arg7[%c0_8, %c0_9] : memref<8x128xf32, #tpu.memory_space<vmem>>, vector<8x128xf32>
      %cst_10 = arith.constant dense<0.000000e+00> : vector<8x8xf32>
      %16 = tpu.matmul %15, %13, %cst_10 {dimension_numbers = #tpu.dot_dimension_numbers<[1], [1], [0], [0], [0, 0, 1, 0], [], []>} : vector<8x128xf32>, vector<8x128xf32>, vector<8x8xf32> -> vector<8x8xf32>
      %cst_11 = arith.constant 0.176776692 : f32
      %17 = vector.broadcast %cst_11 : f32 to vector<8x8xf32>
      %18 = arith.mulf %16, %17 : vector<8x8xf32>
      %c8_i32 = arith.constant 8 : i32
      %19 = arith.muli %arg1, %c8_i32 : i32
      %20 = tpu.iota {dimensions = array<i32: 0>} : vector<8x8xi32>
      %21 = vector.broadcast %19 : i32 to vector<8x8xi32>
      %22 = arith.addi %21, %20 : vector<8x8xi32>
      %c8_i32_12 = arith.constant 8 : i32
      %23 = arith.muli %arg2, %c8_i32_12 : i32
      %24 = tpu.iota {dimensions = array<i32: 1>} : vector<8x8xi32>
      %25 = vector.broadcast %23 : i32 to vector<8x8xi32>
      %26 = arith.addi %25, %24 : vector<8x8xi32>
      %27 = arith.cmpi sle, %26, %22 : vector<8x8xi32>
      %cst_13 = arith.constant -1.000000e+30 : f32
      %28 = vector.broadcast %cst_13 : f32 to vector<8x8xf32>
      %29 = arith.select %27, %18, %28 : vector<8x8xi1>, vector<8x8xf32>
      %c0_14 = arith.constant 0 : index
      %c0_15 = arith.constant 0 : index
      %30 = vector.load %arg8[%c0_14, %c0_15] : memref<8x1xf32, #tpu.memory_space<vmem>>, vector<8x1xf32>
      %cst_16 = arith.constant dense<0xFF800000> : vector<8xf32>
      %31 = vector.multi_reduction <maximumf>, %29, %cst_16 [1] : vector<8x8xf32> to vector<8xf32>
      %32 = vector.shape_cast %31 : vector<8xf32> to vector<8x1xf32>
      %33 = arith.maximumf %30, %32 : vector<8x1xf32>
      %34 = arith.subf %30, %33 : vector<8x1xf32>
      %35 = math.exp %34 : vector<8x1xf32>
      %36 = vector.broadcast %33 : vector<8x1xf32> to vector<8x8xf32>
      %37 = arith.subf %29, %36 : vector<8x8xf32>
      %38 = math.exp %37 : vector<8x8xf32>
      %c0_17 = arith.constant 0 : index
      %c0_18 = arith.constant 0 : index
      %39 = vector.load %arg9[%c0_17, %c0_18] : memref<8x1xf32, #tpu.memory_space<vmem>>, vector<8x1xf32>
      %40 = arith.mulf %35, %39 : vector<8x1xf32>
      %cst_19 = arith.constant dense<0.000000e+00> : vector<8xf32>
      %41 = vector.multi_reduction <add>, %38, %cst_19 [1] : vector<8x8xf32> to vector<8xf32>
      %42 = vector.shape_cast %41 : vector<8xf32> to vector<8x1xf32>
      %43 = arith.addf %40, %42 : vector<8x1xf32>
      %c0_20 = arith.constant 0 : index
      %c0_21 = arith.constant 0 : index
      %44 = vector.load %arg9[%c0_20, %c0_21] : memref<8x1xf32, #tpu.memory_space<vmem>>, vector<8x1xf32>
      tpu.vector_store %arg9[%c0_20, %c0_21], %43 {strides = array<i32>} : memref<8x1xf32, #tpu.memory_space<vmem>>, vector<8x1xf32>,
      %c0_22 = arith.constant 0 : index
      %c0_23 = arith.constant 0 : index
      %45 = vector.load %arg10[%c0_22, %c0_23] : memref<8x128xf32, #tpu.memory_space<vmem>>, vector<8x128xf32>
      %46 = vector.broadcast %35 : vector<8x1xf32> to vector<8x128xf32>
      %47 = arith.mulf %46, %45 : vector<8x128xf32>
      %cst_24 = arith.constant dense<0.000000e+00> : vector<8x128xf32>
      %48 = tpu.matmul %38, %14, %cst_24 {dimension_numbers = #tpu.dot_dimension_numbers<[1], [0], [0], [1], [0, 0, 1, 1], [], []>} : vector<8x8xf32>, vector<8x128xf32>, vector<8x128xf32> -> vector<8x128xf32>
      %49 = arith.addf %47, %48 : vector<8x128xf32>
      %c0_25 = arith.constant 0 : index
      %c0_26 = arith.constant 0 : index
      %50 = vector.load %arg10[%c0_25, %c0_26] : memref<8x128xf32, #tpu.memory_space<vmem>>, vector<8x128xf32>
      tpu.vector_store %arg10[%c0_25, %c0_26], %49 {strides = array<i32>} : memref<8x128xf32, #tpu.memory_space<vmem>>, vector<8x128xf32>,
      %c0_27 = arith.constant 0 : index
      %c0_28 = arith.constant 0 : index
      %51 = vector.load %arg8[%c0_27, %c0_28] : memref<8x1xf32, #tpu.memory_space<vmem>>, vector<8x1xf32>
      tpu.vector_store %arg8[%c0_27, %c0_28], %33 {strides = array<i32>} : memref<8x1xf32, #tpu.memory_space<vmem>>, vector<8x1xf32>,
    } else {
    }
    %c0_i32_2 = arith.constant 0 : i32
    %6 = arith.cmpi eq, %arg2, %c0_i32_2 : i32
    %7 = arith.extui %6 : i1 to i32
    %c0_i32_3 = arith.constant 0 : i32
    %8 = arith.cmpi ne, %7, %c0_i32_3 : i32
    scf.if %8 {
      %c0 = arith.constant 0 : index
      %c0_4 = arith.constant 0 : index
      %9 = vector.load %arg9[%c0, %c0_4] : memref<8x1xf32, #tpu.memory_space<vmem>>, vector<8x1xf32>
      %10 = tpu.reciprocal %9 {approx = true} : vector<8x1xf32> -> vector<8x1xf32>
      %c0_5 = arith.constant 0 : index
      %c0_6 = arith.constant 0 : index
      %11 = vector.load %arg10[%c0_5, %c0_6] : memref<8x128xf32, #tpu.memory_space<vmem>>, vector<8x128xf32>
      %12 = vector.broadcast %10 : vector<8x1xf32> to vector<8x128xf32>
      %13 = arith.mulf %11, %12 : vector<8x128xf32>
      %14 = vector.extract_strided_slice %13 {offsets = [0, 0], sizes = [8, 16], strides = [1, 1]} : vector<8x128xf32> to vector<8x16xf32>
      %c0_7 = arith.constant 0 : index
      %c0_8 = arith.constant 0 : index
      %c0_9 = arith.constant 0 : index
      %15 = vector.load %arg6[%c0_7, %c0_8, %c0_9] : memref<1x8x16xf32, #tpu.memory_space<vmem>>, vector<1x8x16xf32>
      %16 = vector.shape_cast %15 : vector<1x8x16xf32> to vector<8x16xf32>
      %17 = vector.shape_cast %14 : vector<8x16xf32> to vector<1x8x16xf32>
      tpu.vector_store %arg6[%c0_7, %c0_8, %c0_9], %17 {strides = array<i32>} : memref<1x8x16xf32, #tpu.memory_space<vmem>>, vector<1x8x16xf32>,
    } else {
    }
    return
  }
  func.func @transform_0(%arg0: i32, %arg1: i32, %arg2: i32) -> (i32, i32, i32) {
    %c0_i32 = arith.constant 0 : i32
    %c0_i32_0 = arith.constant 0 : i32
    return %arg0, %arg1, %c0_i32 : i32, i32, i32
  }
  func.func @transform_1(%arg0: i32, %arg1: i32, %arg2: i32) -> (i32, i32, i32) {
    %0 = arith.minsi %arg2, %arg1 : i32
    %c0_i32 = arith.constant 0 : i32
    %c0_i32_0 = arith.constant 0 : i32
    return %arg0, %0, %c0_i32 : i32, i32, i32
  }
  func.func @transform_2(%arg0: i32, %arg1: i32, %arg2: i32) -> (i32, i32) {
    %c0_i32 = arith.constant 0 : i32
    %c0_i32_0 = arith.constant 0 : i32
    %c0_i32_1 = arith.constant 0 : i32
    return %c0_i32, %c0_i32_0 : i32, i32
  }
  func.func @transform_3(%arg0: i32, %arg1: i32, %arg2: i32) -> (i32, i32, i32) {
    %c0_i32 = arith.constant 0 : i32
    %c0_i32_0 = arith.constant 0 : i32
    return %arg0, %arg1, %c0_i32 : i32, i32, i32
  }
}

</mosaic_0001>

<bundles_post_ra>
// kernel: tpu_custom_call.1
= control target key start
LH: loop header
LB: loop body
LE: loop exit
PB: predicated region body
PF: predicated region fallthrough
CT: control target
= control target key end

     0   :  { %s1419_s0 = inlined_call_operand.hbm [shape: f32[2,8,32], index: 0, kind: input, shape index: {}]   ;;  %s1420_s1 = inlined_call_operand.hbm [shape: f32[2,8,32], index: 1, kind: input, shape index: {}]   ;;  %s1421_s2 = inlined_call_operand.hbm [shape: f32[32,384], index: 2, kind: input, shape index: {}]   ;;  %s1422_s3 = inlined_call_operand.hbm [shape: f32[2,8,16], index: 3, kind: output, shape index: {}]  }
   0x1   :  { %1428 = sst [smem:[#allocation18_spill]] %s1421_s2 }
   0x2   :  { %8 = vsyncpa [#allocation7], 0 }
   0x3   :  { %10 = vsyncpa [#allocation7 + $0x1], 0 }
   0x4   :  { %11 = vsyncpa [#allocation10], 0 }
   0x5   :  { %13 = vsyncpa [#allocation10 + $0x1], 0 }
   0x6   :  { %14 = vsyncpa [#allocation8], 0 }
   0x7   :  { %16 = vsyncpa [#allocation8 + $0x1], 0  ;;  %s1154_s12 = smov 0   ;;  %s1156_s13 = smov 0  }
   0x8   :  { %s1158_s14 = smov 0   ;;  %s1160_s15 = smov 0  }
   0x9   :  { %s1162_s16 = smov 0   ;;  %s1164_s17 = smov 0  }
   0xa LB: > { %s1185_s18 = sadd.s32 4294967295, %s1121_s17   ;;  %s786_s19 = sadd.s32 4294967294, %s1121_s17   ;;  %s1121_s17 = sphi %s1164_s17, %s22_s17   ;;  %s1117_s16 = sphi %s1162_s16, %s1451_s16   ;;  %s1113_s15 = sphi %s1160_s15, %s1450_s15   ;;  %s1109_s14 = sphi %s1158_s14, %s1449_s14   ;;  %s1105_s13 = sphi %s1156_s13, %s1448_s13   ;;  %s1101_s12 = sphi %s1154_s12, %s1447_s12  }
   0xb   : > { %p63_p0 = scmp.ne.s32.totalorder %s1105_s13, %s1101_s12  ;;  %p1423_p1 = scmp.eq.s32.totalorder %s1185_s18, 0 }
   0xc   : > { %p148_p3 = scmp.eq.s32.totalorder %s786_s19, 1  ;;  %p787_p5 = scmp.ge.s32.totalorder %s1121_s17, 1 }
   0xd   : > { %p1194_p4 = por %p1423_p1, %p63_p0  ;;  %p155_p7 = scmp.lt.s32.totalorder %s1121_s17, 3 }
   0xe   : > { %p1199_p6 = por %p148_p3, %p63_p0  ;;  %s1123_s23 = smov [#allocation11]  }
   0xf   : > { %s1429_s20 = scalar_select %p1194_p4, 1, 0 }
  0x10   : > { %s1430_s21 = scalar_select %p1199_p6, 1, 0 }
  0x11   : > { %p1204_p8 = pnand %p787_p5, %p155_p7  ;;  %s167_s24 = sshll.u32 %s1123_s23, 4  ;;  %s168_s24 = int_to_ptr.vmem [resolvable:$true] %s167_s24 }
  0x12   : > { %s41_s26 = sadd.s32 1, %s1117_s16  ;;  %s1433_s2 = sld [smem:[#allocation18_spill]] }
  0x13   : > { %s1431_s22 = scalar_select %p1204_p8, 1, 0 }
  0x14   : > { %p860_p9 = pneg %p1204_p8 }
  0x16   : > { %p1213_p11 = pnand %p860_p9, %p1423_p1 }
  0x18   : > { %s943_s29 = scalar_lea.hbm %s1433_s2, 1536  ;;  %p945_p13 = pneg %p1213_p11 }
  0x19   : > { %p944_p12 = scmp.ne.s32.totalorder %s1433_s2, %s943_s29  ;;  %p950_p5 = scmp.lt.u32.totalorder %s943_s29, %s1433_s2 }
  0x1b   : > { %p946_p0 = pnand %p945_p13, %p944_p12 }
  0x1d   : > { %p947_p3 = pneg %p946_p0 }
  0x1f   : > { %p952_p7 = pnand %p950_p5, %p947_p3 }
  0x21   : > { %955 = shalt.err (!%p952_p7)
}
  0x22   : > { %s956_s7 = scalar_lea.vmem %s168_s24, 1536  ;;  %p964_p2 = scmp.lt.s32.totalorder %s168_s24, %s168_s24 }
  0x23   : > { %p957_p9 = scmp.ne.s32.totalorder %s168_s24, %s956_s7  ;;  %p965_p6 = scmp.lt.s32.totalorder %s956_s7, %s956_s7 }
  0x25   : > { %p959_p10 = pnand %p957_p9, %p945_p13  ;;  %p966_p4 = por %p965_p6, %p964_p2 }
  0x27   : > { %p960_p1 = pneg %p959_p10 }
  0x29   : > { %p967_p8 = pnand %p966_p4, %p960_p1 }
  0x2b   : > { %970 = shalt.err (!%p967_p8)
}
  0x2c   : > { %s1124_s8 = smov 384   ;;  %s1125_s9 = smov 24  }
  0x2d   : > { %863 = dma.hbm_to_vmem [thread:$0]  (!%p1213_p11), %s1433_s2, 1536, %s168_s24, [#allocation10], %s1124_s8, %s1124_s8, %s1125_s9  }
  0x2e   : > { %p43_p1 = scmp.ge.s32.totalorder %s41_s26, 2  ;;  %s50_s19 = sadd.s32 1, %s1109_s14 }
  0x2f   : > { %p57_p2 = scmp.ne.s32.totalorder %s1109_s14, %s1105_s13  ;;  %p58_p4 = scmp.eq.s32.totalorder %s1121_s17, 0 }
  0x30   : > { %s1453_s26 = smov (%p43_p1, %s41_s26), 0  ;;  %p1436_p8 = scmp.eq.s32.totalorder %s1185_s18, 1 }
  0x31   : > { %1434 = sst [smem:[#allocation17_spill]] %s1453_s26  ;;  %p1240_p6 = por %p58_p4, %p57_p2 }
  0x32   : > { %p1246_p10 = por %p1436_p8, %p57_p2  ;;  %s45_s27 = ssub.s32 %s1117_s16, %s1453_s26 }
  0x33   : > { %p876_p11 = scmp.lt.s32.totalorder %s1121_s17, 2  ;;  %p48_p12 = scmp.eq.s32.totalorder %s45_s27, 0 }
  0x34   : > { %s1437_s25 = scalar_select %p1246_p10, 1, 0 }
  0x35   : > { %s181_s24 = sand.u32 1, %s1109_s14   ;;  %s791_s30 = sshll.u32 %s1117_s16, 7 }
  0x36   : > { %s1254_s28 = sshll.u32 %s181_s24, 3  ;;  %s1263_s6 = scalar_lea.hbm %s1419_s0, %s791_s30 }
  0x37   : > { %s1257_s29 = scalar_select %p48_p12, %s1109_s14, %s50_s19  }
  0x38   : > { %s185_s7 = scalar_lea.vmem [#allocation6], %s1254_s28  ;;  %p1270_p13 = pnand %p876_p11, %p1240_p6 }
  0x39   : > { %s193_s8 = sshll.u32 %s185_s7, 4  ;;  %s1277_s19 = scalar_lea.hbm %s1420_s1, %s791_s30  ;;  %s1266_s8 = int_to_ptr.vmem [resolvable:$true] %s193_s8 }
  0x3a   : > { %s200_s27 = sand.u32 1, %s1121_s17   ;;  %s182_s4 = scalar_lea.sflag [#allocation7], %s181_s24 }
  0x3b   : > { %s971_s5 = scalar_lea.hbm %s1263_s6, 128  ;;  %p973_p3 = pneg %p1270_p13 }
  0x3c   : > { %p972_p0 = scmp.ne.s32.totalorder %s1263_s6, %s971_s5  ;;  %s976_s2 = scalar_lea.hbm %s1419_s0, 256 }
  0x3d   : > { %p977_p9 = scmp.lt.u32.totalorder %s1263_s6, %s1419_s0  ;;  %p978_p1 = scmp.lt.u32.totalorder %s976_s2, %s971_s5 }
  0x3e   : > { %p974_p5 = pnand %p973_p3, %p972_p0  ;;  %p980_p4 = scmp.lt.u32.totalorder %s971_s5, %s1263_s6 }
  0x3f   : > { %p979_p2 = por %p978_p1, %p977_p9 }
  0x40   : > { %p975_p7 = pneg %p974_p5 }
  0x41   : > { %p981_p6 = por %p980_p4, %p979_p2 }
  0x43   : > { %p982_p8 = pnand %p981_p6, %p975_p7 }
  0x45   : > { %985 = shalt.err (!%p982_p8)
}
  0x46   : > { %s986_s24 = scalar_lea.vmem %s1266_s8, 128  ;;  %s1126_s30 = smov [#allocation6]  }
  0x47   : > { %p987_p11 = scmp.ne.s32.totalorder %s1266_s8, %s986_s24  ;;  %s991_s11 = sshll.u32 %s1126_s30, 4  ;;  %s992_s11 = int_to_ptr.vmem [resolvable:$false] %s991_s11 }
  0x48   : > { %s993_s26 = scalar_lea.vmem %s992_s11, 256  ;;  %p994_p5 = scmp.lt.s32.totalorder %s1266_s8, %s992_s11 }
  0x49   : > { %p989_p12 = pnand %p987_p11, %p973_p3  ;;  %p995_p9 = scmp.lt.s32.totalorder %s993_s26, %s986_s24 }
  0x4b   : > { %p990_p0 = pneg %p989_p12  ;;  %p996_p1 = por %p995_p9, %p994_p5 }
  0x4d   : > { %p997_p2 = pnand %p996_p1, %p990_p0 }
  0x4f   : > { %1000 = shalt.err (!%p997_p2)
}
  0x50   : > { %867 = dma.hbm_to_vmem [thread:$0]  (!%p1270_p13), %s1263_s6, 128, %s1266_s8, %s182_s4  }
  0x51   : > { %s204_s2 = scalar_lea.vmem [#allocation9], %s1254_s28  ;;  %s201_s23 = scalar_lea.sflag [#allocation10], %s200_s27 }
  0x52   : > { %s214_s5 = sshll.u32 %s204_s2, 4  ;;  %s1001_s7 = scalar_lea.hbm %s1277_s19, 128  ;;  %s215_s5 = int_to_ptr.vmem [resolvable:$true] %s214_s5 }
  0x53   : > { %p1002_p7 = scmp.ne.s32.totalorder %s1277_s19, %s1001_s7  ;;  %s1006_s30 = scalar_lea.hbm %s1420_s1, 256 }
  0x54   : > { %p1007_p8 = scmp.lt.u32.totalorder %s1277_s19, %s1420_s1  ;;  %p1008_p11 = scmp.lt.u32.totalorder %s1006_s30, %s1001_s7 }
  0x55   : > { %p1004_p4 = pnand %p1002_p7, %p973_p3  ;;  %p1010_p0 = scmp.lt.u32.totalorder %s1001_s7, %s1277_s19 }
  0x56   : > { %p1009_p12 = por %p1008_p11, %p1007_p8 }
  0x57   : > { %p1005_p6 = pneg %p1004_p4 }
  0x58   : > { %p1011_p5 = por %p1010_p0, %p1009_p12 }
  0x5a   : > { %p1012_p9 = pnand %p1011_p5, %p1005_p6 }
  0x5c   : > { %1015 = shalt.err (!%p1012_p9)
}
  0x5d   : > { %s1016_s28 = scalar_lea.vmem %s215_s5, 128  ;;  %s1127_s6 = smov [#allocation9]  }
  0x5e   : > { %p1017_p1 = scmp.ne.s32.totalorder %s215_s5, %s1016_s28  ;;  %s1021_s8 = sshll.u32 %s1127_s6, 4  ;;  %s1022_s8 = int_to_ptr.vmem [resolvable:$false] %s1021_s8 }
  0x5f   : > { %s1023_s27 = scalar_lea.vmem %s1022_s8, 256  ;;  %p1024_p4 = scmp.lt.s32.totalorder %s215_s5, %s1022_s8 }
  0x60   : > { %p1019_p2 = pnand %p1017_p1, %p973_p3  ;;  %p1025_p10 = scmp.lt.s32.totalorder %s1023_s27, %s1016_s28 }
  0x62   : > { %p1020_p7 = pneg %p1019_p2  ;;  %p1026_p8 = por %p1025_p10, %p1024_p4 }
  0x64   : > { %p1027_p11 = pnand %p1026_p8, %p1020_p7 }
  0x66   : > { %1030 = shalt.err (!%p1027_p11)
}
  0x67   : > { %870 = dma.hbm_to_vmem [thread:$0]  (!%p1270_p13), %s1277_s19, 128, %s215_s5, %s201_s23  }
  0x68   : > { %p1439_p6 = scmp.ne.s32.totalorder %s1431_s22, 0 }
  0x69   : > { %s1330_s4 = sand.u32 (!%p1439_p6), 1, %s1105_s13   ;;  %p1440_p10 = scmp.ne.s32.totalorder (!%p1439_p6), %s1429_s20, 0 }
  0x6a   : > { %223 = sbr.rel (%p1439_p6) target bundleno = 1157 (0x485), region = 32  ;;  %s1333_s2 = sshll.u32 (!%p1439_p6), %s1330_s4, 3 }
  0x6b   : > { %s226_s7 = scalar_lea.sflag (!%p1439_p6), [#allocation7], %s1330_s4  ;;  %s229_s10 = scalar_lea.vmem (!%p1439_p6), [#allocation6], %s1333_s2 }
  0x71   : > { %1084 = dma.done.wait (%p1440_p10), %s226_s7, 128  }
  0x72   : > { %1086 = vsyncadd (%p1440_p10), %s226_s7, 4294967168  ;;  %s234_s22 = sand.u32 1, %s1185_s18   ;;  %s238_s19 = scalar_lea.vmem [#allocation9], %s1333_s2 }
  0x73   : > { %s235_s9 = scalar_lea.sflag [#allocation10], %s234_s22 }
  0x74   : > { %1088 = dma.done.wait (%p1440_p10), %s235_s9, 128  }
  0x75   : > { %1090 = vsyncadd (%p1440_p10), %s235_s9, 4294967168  ;;  %p1441_p13 = scmp.eq.s32.totalorder %s1185_s18, 0 }
  0x77   : > { %1092 = dma.done.wait (%p1441_p13), [#allocation10], 1536   ;;  %p1442_p3 = pmov %p1441_p13 }
  0x78   : > { %v1128_v0 = vmov 0.0|0.0   ;;  %v1129_v1 = vmov 0.0   ;;  %vm1130_vm0 = vmmov 0   ;;  %v366_v2 = vld [vmem:[#allocation11 + $0x8] sm:$0xff]  ;;  %v368_v3 = vld [vmem:[#allocation11 + $0x20] sm:$0xff]  ;;  %v367_v6 = vld [vmem:[#allocation11 + $0x18] sm:$0xff]  ;;  %v521_v27 = vlaneseq }
  0x79   : > { %1094 = vsyncadd (%p1442_p3), [#allocation10], 4294965760  ;;  %836 = vmatprep.subr.bf16.mxu0 %v1128_v0  ;;  %441 = vmatprep.mubr.f32.mxu1 %v1129_v1  ;;  %v365_v4 = vld [vmem:[#allocation11] sm:$0xff]  ;;  %v842_v5 = vpack.c.bf16 %v368_v3, %v366_v2  ;;  %v281_v7 = vld [vmem:[#allocation11 + $0x10] sm:$0xff]  ;;  %vm285_vm1 = vcmask 261120   ;;  %vm276_vm2 = vcmask 7168  }
  0x7a   : > { %823 = vmatprep.mubr.msk.f32.mxu0 %vm1130_vm0, %v1129_v1  ;;  %v282_v8 = vld [vmem:[#allocation11 + $0x28] sm:$0xff]  ;;  %v844_v9 = vpack.c.bf16 %v367_v6, %v365_v4  ;;  %v370_v11 = vld [vmem:[#allocation11 + $0x38] sm:$0xff]  ;;  %v372_v12 = vld [vmem:[#allocation11 + $0x50] sm:$0xff]  ;;  %v1131_v26 = vmov -1e+30   ;;  %278 = vst.msk [vmem:[#allocation4] sm:$0xff] %vm276_vm2, %v1129_v1 }
  0x7b   : > { %v837_v10 = vpack.c.bf16 %v282_v8, %v281_v7  ;;  %v369_v13 = vld [vmem:[#allocation11 + $0x30] sm:$0xff]  ;;  %843 = vmatprep.subr.bf16.mxu1 %v842_v5  ;;  %v846_v14 = vpack.c.bf16 %v372_v12, %v370_v11  ;;  %v371_v15 = vld [vmem:[#allocation11 + $0x48] sm:$0xff]  ;;  %v283_v16 = vld [vmem:[#allocation11 + $0x40] sm:$0xff]  ;;  %277 = vst.msk [vmem:[#allocation3] sm:$0xff] %vm276_vm2, %v1131_v26  ;;  %v522_v28 = vshrl.u32 %v521_v27, 7  ;;  %v527_v29 = vand.u32 127, %v521_v27 }
  0x7c   : > { %v284_v17 = vld [vmem:[#allocation11 + $0x58] sm:$0xff]  ;;  %845 = vmatpush1.bf16.msra.mxu1 %v844_v9  ;;  %v848_v18 = vpack.c.bf16 %v371_v15, %v369_v13  ;;  %v280_v21 = vld [vmem:[%s229_s10] sm:$0xff]  ;;  %vm533_vm4 = vcmask 64512   ;;  %v1132_v35 = vmov 0   ;;  %s803_s18 = sshll.u32 %s1113_s15, 7  ;;  %s269_s20 = scalar_lea.vmem [#allocation12], %s1333_s2 }
  0x7d   : > { %838 = vmatpush3.bf16.msra.mxu0 %v837_v10  ;;  %v840_v19 = vpack.c.bf16 %v284_v17, %v283_v16  ;;  %847 = vmatprep.subr.bf16.mxu1 %v846_v14  ;;  %v364_v20 = vld [vmem:[%s238_s19] sm:$0xff]  ;;  %vm530_vm3 = vcmp.le.s32.totalorder %v527_v29, %v522_v28  ;;  %s669_s5 = sshll.u32 %s269_s20, 4  ;;  %vm652_vm5 = vcmask 130048   ;;  %s1370_s30 = scalar_lea.hbm %s1422_s3, %s803_s18  ;;  %s1372_s5 = int_to_ptr.vmem [resolvable:$true] %s669_s5 }
  0x7e   : > { %839 = vmatprep.subr.bf16.mxu0 %v1128_v0  ;;  %935 = vset.pattern.permute.xlu0 %v1132_v35  ;;  %s655_s11 = scalar_lea.sflag [#allocation8], %s1330_s4  ;;  %s1031_s26 = scalar_lea.vmem %s1372_s5, 128 }
  0x7f   : > { %936 = vset.pattern.permute.xlu1 %v1132_v35  ;;  %p1032_p12 = scmp.ne.s32.totalorder %s1372_s5, %s1031_s26  ;;  %p1443_p0 = scmp.ne.s32.totalorder %s1437_s25, 0 }
  0x80   : > { %849 = vmatpush1.bf16.msra.mxu1 %v848_v18  ;;  %s1133_s15 = smov [#allocation12]  }
  0x81   : > { %841 = vmatpush3.bf16.msra.mxu0 %v840_v19  ;;  %831 = vmatprep.subr.mxu1 %v1129_v1  ;;  %v549_v47 = vld [vmem:[#allocation4] sm:$0xff]  ;;  %p1033_p5 = pnand %p1032_p12, %p1443_p0  ;;  %s1035_s28 = sshll.u32 %s1133_s15, 4  ;;  %s1036_s28 = int_to_ptr.vmem [resolvable:$false] %s1035_s28 }
  0x82   : > { %826 = vmatprep.subr.mxu0 %v1129_v1  ;;  %v532_v36 = vld [vmem:[#allocation3] sm:$0xff]  ;;  %s1037_s6 = scalar_lea.vmem %s1036_s28, 256  ;;  %p1038_p1 = scmp.lt.s32.totalorder %s1372_s5, %s1036_s28 }
  0x83   : > { %800 = vmatmul.mubr.msk.f32.vlgmr.msra.gmra.mrb[0].mxu1 %vm285_vm1, %v364_v20  ;;  %p1034_p9 = pneg %p1033_p5  ;;  %p1039_p2 = scmp.lt.s32.totalorder %s1037_s6, %s1031_s26 }
  0x84   : > { %824 = vmatmul.mubr.msk.f32.vlgmr.msra.gmra.mrb[0].mxu0 %vm285_vm1, %v280_v21  ;;  %833 = vmatprep.mubr.msk.f32.mxu1 %vm1130_vm0, %v1129_v1 }
  0x85   : > { %828 = vmatprep.mubr.msk.f32.mxu0 %vm1130_vm0, %v1129_v1  ;;  %p1040_p7 = por %p1039_p2, %p1038_p1 }
  0x87   : > { %p1041_p4 = pnand %p1040_p7, %p1034_p9 }
 0x156   : > { %v443_v22 = vpop.f32.mrb[0].mxu1 }
 0x157   : > { %v355_v23 = vpop.f32.mrb[0].mxu0  ;;  %v445_v24 = vpop.f32.mrb[1].mxu1  ;;  %827 = vmatpush3.xpose.msra.mxu0 %v443_v22 }
 0x158   : > { %v825_v25 = vpop.f32.mrb[1].mxu0  ;;  %832 = vmatpush3.msra.mxu1 %v445_v24 }
 0x15a   : > { %829 = vmatmul.mubr.f32.vlgmr.msra.gmra.mrb[2].mxu0 %v355_v23 }
 0x22d   : > { %v515_v30 = vpop.f32.mrb[2].mxu0 }
 0x22e   : > { %v519_v31 = vmul.f32 0.17677669, %v515_v30  ;;  %v830_v32 = vpop.f32.mrb[3].mxu0 }
 0x230   : > { %v531_v33 = vsel %vm530_vm3, %v519_v31, -1e+30 }
 0x231   : > { %v534_v34 = vsel %vm533_vm4, %v531_v33, -inf }
 0x232   : > { %535 = vmax.xlane.f32.xlu0 %v534_v34 }
 0x2bf   : > { %v536_v37 = vpop.xlane.xlu0 %535 }
 0x2c0   : > { %v537_v38 = vmax.f32 %v532_v36, %v536_v37 }
 0x2c2   : > { %v538_v39 = vsub.f32 %v532_v36, %v537_v38  ;;  %639 = vst.msk [vmem:[#allocation3] sm:$0xff] %vm276_vm2, %v537_v38  ;;  %543 = vperm.xlu0 %935, %v537_v38  }
 0x2c4   : > { %v539_v45 = vmul.f32 1.442695, %v538_v39 }
 0x341   : > { %v544_v40 = vpop.permute.xlu0 %543 }
 0x342   : > { %v546_v41 = vsub.f32 %v531_v33, %v544_v40 }
 0x344   : > { %v547_v42 = vmul.f32 1.442695, %v546_v41 }
 0x346   : > { %937 = vpow2.f32 %v547_v42 }
 0x347   : > { %939 = vpow2.f32 %v539_v45 }
 0x350   : > { %v938_v43 = vpop.eup %937 }
 0x351   : > { %834 = vmatmul.mubr.msk.f32.vlgmr.msra.gmra.mrb[2].mxu1 %vm533_vm4, %v938_v43  ;;  %v551_v44 = vsel %vm533_vm4, %v938_v43, 0.0  ;;  %v940_v46 = vpop.eup %939 }
 0x352   : > { %552 = vadd.xlane.f32.xlu1 %v551_v44  ;;  %v550_v48 = vmul.f32 %v940_v46, %v549_v47 }
 0x363   : > { %560 = vperm.xlu1 %936, %v940_v46  }
 0x3df   : > { %v553_v49 = vpop.xlane.xlu1 %552 }
 0x3e0   : > { %v554_v50 = vadd.f32 %v553_v49, %v550_v48 }
 0x3e2   : > { %556 = vst.msk [vmem:[#allocation4] sm:$0xff] %vm276_vm2, %v554_v50 }
 0x3e3   : > { %v561_v55 = vpop.permute.xlu1 %560 }
 0x3e4   : > { %v563_v56 = vmul.f32 0.0, %v561_v55 }
 0x3e9   : > { %v643_v51 = vld [vmem:[#allocation4] sm:$0xff] }
 0x3ea   : > { %941 = vrcp.f32 %v643_v51 }
 0x3f4   : > { %v942_v52 = vpop.eup %941 }
 0x3f5   : > { %648 = vperm.xlu1 %936, %v942_v52  }
 0x424   : > { %v633_v53 = vpop.f32.mrb[2].mxu1 }
 0x425   : > { %v835_v54 = vpop.f32.mrb[3].mxu1  ;;  %v637_v57 = vadd.f32 %v633_v53, %v563_v56 }
 0x474   : > { %v649_v58 = vpop.permute.xlu1 %648 }
 0x475   : > { %v651_v59 = vmul.f32 %v649_v58, %v637_v57 }
 0x477   : > { %653 = vst.msk [vmem:[%s269_s20] sm:$0xff] %vm652_vm5, %v651_v59 }
 0x478   : > { %1044 = shalt.err (!%p1041_p4)
}
 0x479   : > { %s1045_s8 = scalar_lea.hbm %s1370_s30, 128  ;;  %s1049_s2 = scalar_lea.hbm %s1422_s3, 256 }
 0x47a   : > { %p1046_p8 = scmp.ne.s32.totalorder %s1370_s30, %s1045_s8  ;;  %p1050_p10 = scmp.lt.u32.totalorder %s1370_s30, %s1422_s3 }
 0x47b   : > { %p1051_p13 = scmp.lt.u32.totalorder %s1049_s2, %s1045_s8  ;;  %p1053_p12 = scmp.lt.u32.totalorder %s1045_s8, %s1370_s30 }
 0x47c   : > { %p1047_p11 = pnand %p1046_p8, %p1443_p0 }
 0x47d   : > { %p1052_p3 = por %p1051_p13, %p1050_p10 }
 0x47e   : > { %p1048_p6 = pneg %p1047_p11 }
 0x47f   : > { %p1054_p5 = por %p1053_p12, %p1052_p3 }
 0x481   : > { %p1055_p9 = pnand %p1054_p5, %p1048_p6 }
 0x483   : > { %1058 = shalt.err (!%p1055_p9)
}
 0x484   : > { %858 = dma.vmem_to_hbm [thread:$0]  (%p1443_p0), %s1372_s5, 128, %s1370_s30, %s655_s11  }
 0x485 PF: > { %s681_s22 = sand.u32 1, %s1101_s12   ;;  %p1444_p1 = scmp.ne.s32.totalorder %s1430_s21, 0 }
 0x486   : > { %p1445_p2 = scmp.ge.s32.totalorder %s1121_s17, 2  ;;  %s682_s9 = scalar_lea.sflag [#allocation8], %s681_s22 }
 0x488   : > { %p872_p7 = pnand %p1445_p2, %p1444_p1 }
 0x48a   : > { %1096 = dma.done.wait (!%p872_p7), %s682_s9, 128  }
 0x48b   : > { %1098 = vsyncadd (!%p872_p7), %s682_s9, 4294967168  ;;  %s22_s17 = sadd.s32 1, %s1121_s17   ;;  %s1446_s25 = sld [smem:[#allocation17_spill]] }
 0x48c   : > { %p19_p4 = scmp.ge.s32.totalorder %s22_s17, 4   ;;  %s1447_s12 = smov %s1105_s13 }
 0x48d   : > { %s1448_s13 = smov %s1109_s14  ;;  %s1449_s14 = smov %s1257_s29 }
 0x48e   : > { %s1450_s15 = smov %s1117_s16  ;;  %21 = sbr.rel (!%p19_p4) target bundleno = 10 (0xa), region = 106 }
 0x491   : > { %s1451_s16 = smov %s1446_s25 }
 0x495   :  { %687 = vsyncpa [#allocation7], 1 }
 0x496   :  { %689 = vsyncpa [#allocation7 + $0x1], 1 }
 0x497   :  { %690 = vsyncpa [#allocation10], 1 }
 0x498   :  { %692 = vsyncpa [#allocation10 + $0x1], 1 }
 0x499   :  { %693 = vsyncpa [#allocation8], 1 }
 0x49a   :  { %695 = vsyncpa [#allocation8 + $0x1], 1 }

</bundles_post_ra>
